<compile_context>
chip_gen: v7x
topology: tpu7x:2x2x1
jax: 0.10.0
libtpu: 0.0.40
codegen_flags: <defaults>
</compile_context>

<pallas_src>
import jax
import jax.numpy as jnp
from jax import lax
from jax.experimental import pallas as pl
from jax.experimental.pallas import tpu as pltpu


_LANES = 128
_SUBLANES = 8
# Total f32 bytes (both planes) processed as one block (no grid). Keeps the
# resident VMEM footprint (2 inputs + 2 outputs, no double-buffering) at
# <= 8 MiB, well under the 32 MiB scoped-VMEM default.
_SINGLE_BLOCK_MAX_BYTES = 4 * 1024 * 1024
# Large-input tile: (1024, 128) f32 = 512 KiB per block per stream.
_TILE_ROWS = 1024


def _tanh2_kernel(re_ref, im_ref, ore_ref, oim_ref):
    # Elementwise tanh on both lane-dense planes (EUP work only).
    ore_ref[...] = jnp.tanh(re_ref[...])
    oim_ref[...] = jnp.tanh(im_ref[...])


def complex_tanh(x):
    """Pallas implementation of ComplexTanh.forward."""
    orig_shape = x.shape
    if jnp.issubdtype(x.dtype, jnp.complexfloating):
        re = jnp.real(x).astype(jnp.float32)
        im = jnp.imag(x).astype(jnp.float32)
    else:
        # torch.imag would error on a real tensor; treat imag as zeros instead.
        re = x.astype(jnp.float32)
        im = jnp.zeros_like(re)

    n = re.size                      # elements per plane (static)
    total_bytes = 2 * n * 4          # f32 bytes for both planes
    single_block = total_bytes <= _SINGLE_BLOCK_MAX_BYTES

    # Static row-alignment choice: minimal (8,128) alignment for the
    # single-block path, full tile alignment for the gridded path.
    row_mult = _SUBLANES if single_block else _TILE_ROWS
    plane_elems = row_mult * _LANES
    n_pad = (-(-n // plane_elems)) * plane_elems   # ceil to multiple (static)
    pad = n_pad - n

    re_flat = re.reshape(-1)
    im_flat = im.reshape(-1)
    if pad:  # static branch: no pad ops emitted when already aligned
        re_flat = jnp.pad(re_flat, (0, pad))
        im_flat = jnp.pad(im_flat, (0, pad))

    rows = n_pad // _LANES
    re2 = re_flat.reshape(rows, _LANES)
    im2 = im_flat.reshape(rows, _LANES)

    out_shape = (jax.ShapeDtypeStruct((rows, _LANES), jnp.float32),
                 jax.ShapeDtypeStruct((rows, _LANES), jnp.float32))
    cost = pl.CostEstimate(
        flops=0,
        transcendentals=2 * rows * _LANES,          # one tanh per element
        bytes_accessed=4 * rows * _LANES * 4,       # read + write, both planes
    )

    if single_block:
        # Whole planes resident in VMEM as a single block: no grid, no
        # pipeline machinery.
        vmem = pl.BlockSpec(memory_space=pltpu.MemorySpace.VMEM)
        ore, oim = pl.pallas_call(
            _tanh2_kernel,
            out_shape=out_shape,
            in_specs=[vmem, vmem],
            out_specs=(vmem, vmem),
            cost_estimate=cost,
        )(re2, im2)
    else:
        # Large-input path: big lane-dense tiles, double-buffered by BlockSpec.
        grid = (rows // _TILE_ROWS,)   # rows is a multiple of _TILE_ROWS
        spec = pl.BlockSpec((_TILE_ROWS, _LANES), lambda i: (i, 0))
        ore, oim = pl.pallas_call(
            _tanh2_kernel,
            out_shape=out_shape,
            grid_spec=pltpu.PrefetchScalarGridSpec(
                num_scalar_prefetch=0,
                grid=grid,
                in_specs=[spec, spec],
                out_specs=(spec, spec),
            ),
            compiler_params=pltpu.CompilerParams(
                dimension_semantics=("parallel",),   # shards across v7x's 2 TCs
            ),
            cost_estimate=cost,
        )(re2, im2)

    ore = ore.reshape(-1)
    oim = oim.reshape(-1)
    if pad:  # static branch: no slice ops emitted when already aligned
        ore = ore[:n]
        oim = oim[:n]

    return lax.complex(ore.reshape(orig_shape),
                       oim.reshape(orig_shape)).astype(jnp.complex64)


if __name__ == "__main__":
    key = jax.random.PRNGKey(0)
    k_re, k_im = jax.random.split(key)
    shape = (2, 4, 16, 16)  # NCHW, small synthetic shape
    x_re = jax.random.normal(k_re, shape, dtype=jnp.float32)
    x_im = jax.random.normal(k_im, shape, dtype=jnp.float32)
    x = lax.complex(x_re, x_im)  # complex64 input

    out = complex_tanh(x)
    out = jax.block_until_ready(out)

    # Reference check (plain JAX) to make sure semantics match.
    ref = lax.complex(jnp.tanh(x_re), jnp.tanh(x_im))
    assert out.shape == shape and out.dtype == jnp.complex64
    assert jnp.allclose(out, ref, atol=1e-6), "mismatch vs reference"

    print("KERNEL_OK")
</pallas_src>

<mosaic_0001>
module attributes {stable_mosaic.version = 11 : i64} {
  func.func @_tanh2_kernel(%arg0: memref<16x128xf32, #tpu.memory_space<vmem>>, %arg1: memref<16x128xf32, #tpu.memory_space<vmem>>, %arg2: memref<16x128xf32, #tpu.memory_space<vmem>>, %arg3: memref<16x128xf32, #tpu.memory_space<vmem>>) attributes {dimension_semantics = [], scalar_prefetch = 0 : i64, scratch_operands = 0 : i64, tpu.core_type = #tpu.core_type<tc>} {
    %c0 = arith.constant 0 : index
    %c0_0 = arith.constant 0 : index
    %0 = vector.load %arg0[%c0, %c0_0] : memref<16x128xf32, #tpu.memory_space<vmem>>, vector<16x128xf32>
    %1 = math.tanh %0 : vector<16x128xf32>
    %c0_1 = arith.constant 0 : index
    %c0_2 = arith.constant 0 : index
    %2 = vector.load %arg2[%c0_1, %c0_2] : memref<16x128xf32, #tpu.memory_space<vmem>>, vector<16x128xf32>
    tpu.vector_store %arg2[%c0_1, %c0_2], %1 {strides = array<i32>} : memref<16x128xf32, #tpu.memory_space<vmem>>, vector<16x128xf32>,
    %c0_3 = arith.constant 0 : index
    %c0_4 = arith.constant 0 : index
    %3 = vector.load %arg1[%c0_3, %c0_4] : memref<16x128xf32, #tpu.memory_space<vmem>>, vector<16x128xf32>
    %4 = math.tanh %3 : vector<16x128xf32>
    %c0_5 = arith.constant 0 : index
    %c0_6 = arith.constant 0 : index
    %5 = vector.load %arg3[%c0_5, %c0_6] : memref<16x128xf32, #tpu.memory_space<vmem>>, vector<16x128xf32>
    tpu.vector_store %arg3[%c0_5, %c0_6], %4 {strides = array<i32>} : memref<16x128xf32, #tpu.memory_space<vmem>>, vector<16x128xf32>,
    return
  }
}

</mosaic_0001>

<bundles_post_ra>
// kernel: tpu_custom_call.1
= control target key start
LH: loop header
LB: loop body
LE: loop exit
PB: predicated region body
PF: predicated region fallthrough
CT: control target
= control target key end

     0   :  { %9 = vsyncpa [#allocation3], 0  ;;  %s292_s0 = inlined_call_operand.hbm [shape: f32[16,128], index: 0, kind: input, shape index: {}]   ;;  %s293_s1 = inlined_call_operand.hbm [shape: f32[16,128], index: 1, kind: input, shape index: {}]   ;;  %s294_s2 = inlined_call_operand.hbm [shape: f32[16,128], index: 2, kind: output, shape index: {0}]   ;;  %s295_s3 = inlined_call_operand.hbm [shape: f32[16,128], index: 3, kind: output, shape index: {1}]  }
   0x1   :  { %10 = vsyncpa [#allocation6], 0 }
   0x2   :  { %11 = vsyncpa [#allocation4], 0 }
   0x3   :  { %12 = vsyncpa [#allocation9], 0  ;;  %s199_s12 = smov [#allocation2]   ;;  %s103_s16 = scalar_lea.hbm %s292_s0, 256 }
   0x4   :  { %s18_s13 = sshll.u32 %s199_s12, 4  ;;  %p104_p0 = scmp.ne.s32.totalorder %s292_s0, %s103_s16  ;;  %s19_s13 = int_to_ptr.vmem [resolvable:$true] %s18_s13 }
   0x5   :  { %p107_p1 = scmp.lt.u32.totalorder %s103_s16, %s292_s0 }
   0x7   :  { %p109_p2 = pnand %p107_p1, %p104_p0 }
   0x9   :  { %112 = shalt.err (!%p109_p2)
}
   0xa   :  { %s113_s21 = scalar_lea.vmem %s19_s13, 256  ;;  %p118_p4 = scmp.lt.s32.totalorder %s19_s13, %s19_s13 }
   0xb   :  { %p114_p3 = scmp.ne.s32.totalorder %s19_s13, %s113_s21  ;;  %p119_p5 = scmp.lt.s32.totalorder %s113_s21, %s113_s21 }
   0xd   :  { %p120_p6 = por %p119_p5, %p118_p4 }
   0xf   :  { %p121_p7 = pnand %p120_p6, %p114_p3 }
  0x11   :  { %124 = shalt.err (!%p121_p7)
}
  0x12   :  { %s200_s22 = smov 128   ;;  %s201_s23 = smov 8  }
  0x13   :  { %24 = dma.hbm_to_vmem [thread:$0]  %s292_s0, 256, %s19_s13, [#allocation3], %s200_s22, %s200_s22, %s201_s23  }
  0x14   :  { %s202_s26 = smov [#allocation5]   ;;  %s125_s30 = scalar_lea.hbm %s293_s1, 256 }
  0x15   :  { %s30_s27 = sshll.u32 %s202_s26, 4  ;;  %p126_p8 = scmp.ne.s32.totalorder %s293_s1, %s125_s30  ;;  %s31_s27 = int_to_ptr.vmem [resolvable:$true] %s30_s27 }
  0x16   :  { %p129_p9 = scmp.lt.u32.totalorder %s125_s30, %s293_s1 }
  0x18   :  { %p131_p10 = pnand %p129_p9, %p126_p8 }
  0x1a   :  { %134 = shalt.err (!%p131_p10)
}
  0x1b   :  { %s135_s8 = scalar_lea.vmem %s31_s27, 256  ;;  %p140_p12 = scmp.lt.s32.totalorder %s31_s27, %s31_s27 }
  0x1c   :  { %p136_p11 = scmp.ne.s32.totalorder %s31_s27, %s135_s8  ;;  %p141_p13 = scmp.lt.s32.totalorder %s135_s8, %s135_s8 }
  0x1e   :  { %p142_p0 = por %p141_p13, %p140_p12 }
  0x20   :  { %p143_p1 = pnand %p142_p0, %p136_p11 }
  0x22   :  { %146 = shalt.err (!%p143_p1)
}
  0x23   :  { %36 = dma.hbm_to_vmem [thread:$0]  %s293_s1, 256, %s31_s27, [#allocation6], %s200_s22, %s200_s22, %s201_s23  }
  0x24   :  { %191 = dma.done.wait [#allocation3], 256  }
  0x25   :  { %192 = vsyncadd [#allocation3], 4294967040 }
  0x26   :  { %193 = dma.done.wait [#allocation6], 256  }
  0x27   :  { %194 = vsyncadd [#allocation6], 4294967040  ;;  %v43_v0 = vld [vmem:[#allocation2] sm:$0xff]  ;;  %v44_v1 = vld [vmem:[#allocation2 + $0x8] sm:$0xff]  ;;  %s203_s10 = smov [#allocation7]   ;;  %s204_s12 = smov [#allocation8]  }
  0x28   :  { %v49_v2 = vld [vmem:[#allocation5] sm:$0xff]  ;;  %95 = vtanh.f32 %v43_v0  ;;  %v50_v3 = vld [vmem:[#allocation5 + $0x8] sm:$0xff]  ;;  %s60_s11 = sshll.u32 %s203_s10, 4  ;;  %s72_s13 = sshll.u32 %s204_s12, 4  ;;  %s61_s11 = int_to_ptr.vmem [resolvable:$true] %s60_s11  ;;  %s255_s13 = int_to_ptr.vmem [resolvable:$true] %s72_s13 }
  0x29   :  { %97 = vtanh.f32 %v44_v1  ;;  %s147_s1 = scalar_lea.vmem %s61_s11, 256  ;;  %p152_p3 = scmp.lt.s32.totalorder %s61_s11, %s61_s11 }
  0x2a   :  { %99 = vtanh.f32 %v49_v2  ;;  %p148_p2 = scmp.ne.s32.totalorder %s61_s11, %s147_s1  ;;  %p153_p4 = scmp.lt.s32.totalorder %s147_s1, %s147_s1 }
  0x2b   :  { %101 = vtanh.f32 %v50_v3 }
  0x2c   :  { %p154_p5 = por %p153_p4, %p152_p3 }
  0x2e   :  { %p155_p6 = pnand %p154_p5, %p148_p2 }
  0x32   :  { %v96_v4 = vpop.eup %95 }
  0x33   :  { %v98_v5 = vpop.eup %97  ;;  %47 = vst [vmem:[#allocation7] sm:$0xff] %v96_v4 }
  0x34   :  { %v100_v6 = vpop.eup %99  ;;  %48 = vst [vmem:[#allocation7 + $0x8] sm:$0xff] %v98_v5 }
  0x35   :  { %v102_v7 = vpop.eup %101  ;;  %53 = vst [vmem:[#allocation8] sm:$0xff] %v100_v6 }
  0x36   :  { %158 = shalt.err (!%p155_p6)
}
  0x37   :  { %s159_s16 = scalar_lea.hbm %s294_s2, 256 }
  0x38   :  { %p160_p7 = scmp.ne.s32.totalorder %s294_s2, %s159_s16  ;;  %p163_p8 = scmp.lt.u32.totalorder %s159_s16, %s294_s2 }
  0x3a   :  { %p165_p9 = pnand %p163_p8, %p160_p7 }
  0x3c   :  { %168 = shalt.err (!%p165_p9)
}
  0x3d   :  { %66 = dma.vmem_to_hbm [thread:$0]  %s61_s11, 256, %s294_s2, [#allocation4], %s200_s22, %s200_s22, %s201_s23   ;;  %54 = vst [vmem:[#allocation8 + $0x8] sm:$0xff] %v102_v7 }
  0x3e   :  { %s169_s25 = scalar_lea.vmem %s255_s13, 256  ;;  %p174_p11 = scmp.lt.s32.totalorder %s255_s13, %s255_s13 }
  0x3f   :  { %p170_p10 = scmp.ne.s32.totalorder %s255_s13, %s169_s25  ;;  %p175_p12 = scmp.lt.s32.totalorder %s169_s25, %s169_s25 }
  0x41   :  { %p176_p13 = por %p175_p12, %p174_p11 }
  0x43   :  { %p177_p0 = pnand %p176_p13, %p170_p10 }
  0x45   :  { %180 = shalt.err (!%p177_p0)
}
  0x46   :  { %s181_s28 = scalar_lea.hbm %s295_s3, 256 }
  0x47   :  { %p182_p1 = scmp.ne.s32.totalorder %s295_s3, %s181_s28  ;;  %p185_p2 = scmp.lt.u32.totalorder %s181_s28, %s295_s3 }
  0x49   :  { %p187_p3 = pnand %p185_p2, %p182_p1 }
  0x4b   :  { %190 = shalt.err (!%p187_p3)
}
  0x4c   :  { %78 = dma.vmem_to_hbm [thread:$0]  %s255_s13, 256, %s295_s3, [#allocation9], %s200_s22, %s200_s22, %s201_s23  }
  0x4d   :  { %195 = dma.done.wait [#allocation4], 256  }
  0x4e   :  { %196 = vsyncadd [#allocation4], 4294967040 }
  0x4f   :  { %197 = dma.done.wait [#allocation9], 256  }
  0x50   :  { %198 = vsyncadd [#allocation9], 4294967040 }
  0x51   :  { %85 = vsyncpa [#allocation3], 1 }
  0x52   :  { %86 = vsyncpa [#allocation6], 1 }
  0x53   :  { %87 = vsyncpa [#allocation4], 1 }
  0x54   :  { %88 = vsyncpa [#allocation9], 1 }

</bundles_post_ra>
